<compile_context>
chip_gen: v5e
topology: v5e:2x2
jax: 0.10.0
libtpu: 0.0.40
codegen_flags: <defaults>
</compile_context>

<pallas_src>
import jax
import jax.numpy as jnp
from jax.experimental import pallas as pl
from jax.experimental.pallas import tpu as pltpu

# ---- deterministic "args" / hyper-parameters (module __init__ inputs) -------
EPS = 1e-5          # args.EPS
TAU = 0.5           # args.tau
LAM1 = 1.0          # lam1
LAM2 = 1.0          # lam2
WORLD_SIZE = 1.0    # single device


def _device_tuning():
    """(num_tensorcores, scoped vmem limit) derived from the attached TPU."""
    try:
        kind = jax.devices()[0].device_kind.lower()
    except Exception:  # pragma: no cover - defensive
        kind = ""
    if ("v7" in kind) or ("tpu7" in kind):
        return 2, 48 * 1024 * 1024      # 2 TCs, 64 MiB physical VMEM
    return 1, 96 * 1024 * 1024          # v5e / v6e: 1 TC, 128 MiB physical VMEM


def _recip(x):
    """EUP approx reciprocal + one Newton-Raphson step (~f32-exact)."""
    r = pl.reciprocal(x, approx=True)
    return r * (2.0 - x * r)


def _make_kernel(n_rows, n_cols, tile_rows, steps_per_core,
                 needs_mask, needs_oob_guard):
    """Kernel factory (closes over static shape/tiling parameters)."""

    def kernel(f1_ref, f2_ref, kl_eh_ref, sp1_ref, sp2_ref,
               acc_ref, sp1_acc, sp2_acc):
        c = pl.program_id(0)
        j = pl.program_id(1)

        # Per-core scratch accumulator init.
        @pl.when(j == 0)
        def _init():
            acc_ref[...] = jnp.zeros_like(acc_ref)
            sp1_acc[...] = jnp.zeros_like(sp1_acc)
            sp2_acc[...] = jnp.zeros_like(sp2_acc)

        row0 = (c * steps_per_core + j) * tile_rows

        def _compute():
            f1 = f1_ref[...].astype(jnp.float32)
            f2 = f2_ref[...].astype(jnp.float32)

            if needs_mask:
                rows = row0 + jax.lax.broadcasted_iota(
                    jnp.int32, (tile_rows, 1), 0)
                valid = rows < n_rows
                maskf = valid.astype(jnp.float32)
                # Zero ragged rows BEFORE exp so uninitialized padding (which
                # may be non-finite bit patterns) can never reach the EUP.
                f1 = jnp.where(valid, f1, 0.0)
                f2 = jnp.where(valid, f2, 0.0)

            def softmax_terms(x, sp_acc):
                # One exp pass serves both softmaxes: max(x/tau) = max(x)/tau,
                # and for tau == 0.5, exp((x-m)/tau) == exp(x-m)**2 (VPU mul).
                m = jnp.max(x, axis=-1, keepdims=True)
                e = jnp.exp(x - m)
                rinv = _recip(jnp.sum(e, axis=-1, keepdims=True))
                if TAU == 0.5:
                    e2 = e * e
                else:
                    e2 = jnp.exp((x - m) * (1.0 / TAU))
                r2inv = _recip(jnp.sum(e2, axis=-1, keepdims=True))
                if needs_mask:
                    # Zeroing the (TN,1) reciprocals zeroes whole padded rows
                    # of p / sp downstream -> no (TN,C) mask multiplies.
                    rinv = rinv * maskf
                    r2inv = r2inv * maskf
                p = e * rinv
                sp = e2 * r2inv
                # Column-sum partial: leading-dim reshape is layout-free, the
                # axis-0 sum is pure VPU vreg adds (no cross-sublane XLU).
                sp_acc[...] += jnp.sum(
                    sp.reshape(tile_rows // 8, 8, n_cols), axis=0)
                return p, jnp.log(p + EPS), sp * jnp.log(sp + EPS)

            p1, lp1, t1 = softmax_terms(f1, sp1_acc)
            p2, lp2, t2 = softmax_terms(f2, sp2_acc)

            # Fused KL (both directions) and EH (both inputs) reductions.
            kl_rows = 0.5 * jnp.sum((p1 - p2) * (lp1 - lp2),
                                    axis=1, keepdims=True)       # (TN, 1)
            eh_rows = -0.5 * jnp.sum(t1 + t2, axis=1, keepdims=True)

            kl8 = jnp.sum(kl_rows.reshape(tile_rows // 8, 8, 1), axis=0)
            eh8 = jnp.sum(eh_rows.reshape(tile_rows // 8, 8, 1), axis=0)
            lane = jax.lax.broadcasted_iota(jnp.int32, (8, 128), 1)
            acc_ref[...] += (jnp.where(lane == 0, kl8, 0.0)
                             + jnp.where(lane == 1, eh8, 0.0))

        if needs_oob_guard:
            # Skip tiles entirely past the array (over-covered core split).
            pl.when(row0 < n_rows)(_compute)
        else:
            _compute()

        # Single cross-sublane collapse + output write per core.
        @pl.when(j == steps_per_core - 1)
        def _finalize():
            kl_eh_ref[...] = jnp.sum(acc_ref[...], axis=0, keepdims=True)
            sp1_ref[...] = jnp.sum(sp1_acc[...], axis=0, keepdims=True)
            sp2_ref[...] = jnp.sum(sp2_acc[...], axis=0, keepdims=True)

    return kernel


def ent_loss(feat1, feat2, *, max_tile_rows=None, force_core_splits=None,
             vmem_limit_bytes=None):
    """Single-device EntLoss forward. feat1/feat2: (N, C), f32 or bf16."""
    N, C = feat1.shape
    assert feat2.shape == (N, C)

    cores, default_vmem = _device_tuning()
    if vmem_limit_bytes is None:
        vmem_limit_bytes = default_vmem
    nc_target = force_core_splits if force_core_splits is not None else cores

    # --- tile sizing: 2 inputs x 2 pipeline buffers (input dtype) plus ~12
    # live f32 (TN, C) intermediates must fit under the scoped VMEM limit.
    in_bytes = jnp.dtype(feat1.dtype).itemsize
    per_row_bytes = C * (2 * 2 * in_bytes + 12 * 4)
    budget_rows = int((0.70 * vmem_limit_bytes) // per_row_bytes)
    tn = min(4096, max(budget_rows, 8), N)
    if max_tile_rows is not None:
        tn = min(tn, max_tile_rows)
    tn = max(8, ((tn + 7) // 8) * 8)          # sublane-aligned tile height

    total_blocks = pl.cdiv(N, tn)
    nc = max(1, min(nc_target, total_blocks))
    steps_per_core = pl.cdiv(total_blocks, nc)
    needs_mask = (total_blocks * tn) != N
    needs_oob_guard = (nc * steps_per_core) > total_blocks

    kernel = _make_kernel(N, C, tn, steps_per_core, needs_mask, needs_oob_guard)

    if needs_oob_guard:
        last_block = total_blocks - 1

        def in_map(c, j):
            # Clamp so over-covered tiles never issue a fully-OOB DMA (their
            # compute is skipped in-kernel via pl.when).
            return (jnp.minimum(c * steps_per_core + j, last_block), 0)
    else:
        def in_map(c, j):
            return (c * steps_per_core + j, 0)

    in_spec = pl.BlockSpec((tn, C), in_map)

    kl_eh, sp1s, sp2s = pl.pallas_call(
        kernel,
        out_shape=(
            jax.ShapeDtypeStruct((nc, 128), jnp.float32),  # lane0=kl, lane1=eh
            jax.ShapeDtypeStruct((nc, C), jnp.float32),    # per-core sum of sp1
            jax.ShapeDtypeStruct((nc, C), jnp.float32),    # per-core sum of sp2
        ),
        grid=(nc, steps_per_core),
        in_specs=[in_spec, in_spec],
        out_specs=(
            pl.BlockSpec((1, 128), lambda c, j: (c, 0)),
            pl.BlockSpec((1, C), lambda c, j: (c, 0)),
            pl.BlockSpec((1, C), lambda c, j: (c, 0)),
        ),
        scratch_shapes=[
            pltpu.VMEM((8, 128), jnp.float32),   # kl/eh sublane partials
            pltpu.VMEM((8, C), jnp.float32),     # sp1 column-sum partials
            pltpu.VMEM((8, C), jnp.float32),     # sp2 column-sum partials
        ],
        compiler_params=pltpu.CompilerParams(
            dimension_semantics=("parallel", "arbitrary"),
            vmem_limit_bytes=vmem_limit_bytes,
        ),
    )(feat1, feat2)

    # Tiny epilogue: combine the per-core partials (O(C) work).
    n_f = jnp.float32(N)
    kl = jnp.sum(kl_eh[:, 0]) / n_f
    eh = jnp.sum(kl_eh[:, 1]) / n_f
    m1 = jnp.sum(sp1s, axis=0) / n_f
    m2 = jnp.sum(sp2s, axis=0) / n_f
    he = 0.5 * (-jnp.sum(m1 * jnp.log(m1 + WORLD_SIZE * EPS))
                - jnp.sum(m2 * jnp.log(m2 + WORLD_SIZE * EPS)))
    final = kl + (1.0 + LAM1) * eh - LAM2 * he
    return {"kl": kl, "eh": eh, "he": he, "final": final}


def ent_loss_ref(feat1, feat2):
    """Pure-JAX reference of the PyTorch forward (single-device semantics)."""
    p1 = jax.nn.softmax(feat1, axis=-1)
    p2 = jax.nn.softmax(feat2, axis=-1)
    kl12 = jnp.mean(jnp.sum(p1 * (jnp.log(p1 + EPS) - jnp.log(p2 + EPS)), axis=1))
    kl21 = jnp.mean(jnp.sum(p2 * (jnp.log(p2 + EPS) - jnp.log(p1 + EPS)), axis=1))
    kl = 0.5 * (kl12 + kl21)
    sp1 = jax.nn.softmax(feat1 / TAU, axis=-1)
    sp2 = jax.nn.softmax(feat2 / TAU, axis=-1)
    eh = 0.5 * (jnp.mean(-jnp.sum(sp1 * jnp.log(sp1 + EPS), axis=1))
                + jnp.mean(-jnp.sum(sp2 * jnp.log(sp2 + EPS), axis=1)))
    m1 = jnp.mean(sp1, axis=0)
    m2 = jnp.mean(sp2, axis=0)
    he = 0.5 * (-jnp.sum(m1 * jnp.log(m1 + WORLD_SIZE * EPS))
                - jnp.sum(m2 * jnp.log(m2 + WORLD_SIZE * EPS)))
    final = kl + (1.0 + LAM1) * eh - LAM2 * he
    return {"kl": kl, "eh": eh, "he": he, "final": final}


if __name__ == "__main__":
    key = jax.random.PRNGKey(0)
    k1, k2, k3, k4 = jax.random.split(key, 4)

    # Case 1: single-tile fast path, lane-dense class dim (C = 128).
    f1a = jax.random.normal(k1, (16, 128), dtype=jnp.float32)
    f2a = jax.random.normal(k2, (16, 128), dtype=jnp.float32)
    out_a = ent_loss(f1a, f2a)
    ref_a = ent_loss_ref(f1a, f2a)

    # Case 2: multi-tile path with a ragged last tile and a forced 2-way core
    # split whose grid over-covers the block count (exercises the index_map
    # clamp, the pl.when OOB skip, masking and scratch accumulation).
    f1b = jax.random.normal(k3, (200, 256), dtype=jnp.float32)
    f2b = jax.random.normal(k4, (200, 256), dtype=jnp.float32)
    out_b = ent_loss(f1b, f2b, max_tile_rows=80, force_core_splits=2)
    ref_b = ent_loss_ref(f1b, f2b)

    jax.block_until_ready(out_a["final"])
    jax.block_until_ready(out_b["final"])

    for out, ref in ((out_a, ref_a), (out_b, ref_b)):
        for name in ("kl", "eh", "he", "final"):
            assert jnp.allclose(out[name], ref[name], atol=1e-4, rtol=1e-4), (
                name, out[name], ref[name])

    print("KERNEL_OK")
</pallas_src>

<mosaic_0001>
module attributes {stable_mosaic.version = 11 : i64} {
  func.func @kernel(%arg0: i32, %arg1: i32, %arg2: memref<16x128xf32, #tpu.memory_space<vmem>>, %arg3: memref<16x128xf32, #tpu.memory_space<vmem>>, %arg4: memref<1x128xf32, #tpu.memory_space<vmem>>, %arg5: memref<1x128xf32, #tpu.memory_space<vmem>>, %arg6: memref<1x128xf32, #tpu.memory_space<vmem>>, %arg7: memref<8x128xf32, #tpu.memory_space<vmem>>, %arg8: memref<8x128xf32, #tpu.memory_space<vmem>>, %arg9: memref<8x128xf32, #tpu.memory_space<vmem>>) attributes {dimension_semantics = [#tpu.dimension_semantics<parallel>, #tpu.dimension_semantics<arbitrary>], iteration_bounds = array<i64: 1, 1>, scalar_prefetch = 0 : i64, scratch_operands = 3 : i64, tpu.core_type = #tpu.core_type<tc>, window_params = [{transform_indices = @transform_0, window_bounds = array<i64: 16, 128>}, {transform_indices = @transform_1, window_bounds = array<i64: 16, 128>}, {transform_indices = @transform_2, window_bounds = array<i64: 1, 128>}, {transform_indices = @transform_3, window_bounds = array<i64: 1, 128>}, {transform_indices = @transform_4, window_bounds = array<i64: 1, 128>}]} {
    %c0_i32 = arith.constant 0 : i32
    %0 = arith.cmpi eq, %arg1, %c0_i32 : i32
    %1 = arith.extui %0 : i1 to i32
    %c0_i32_0 = arith.constant 0 : i32
    %2 = arith.cmpi ne, %1, %c0_i32_0 : i32
    scf.if %2 {
      %cst_42 = arith.constant 0.000000e+00 : f32
      %113 = vector.broadcast %cst_42 : f32 to vector<8x128xf32>
      %c0_43 = arith.constant 0 : index
      %c0_44 = arith.constant 0 : index
      %114 = vector.load %arg7[%c0_43, %c0_44] : memref<8x128xf32, #tpu.memory_space<vmem>>, vector<8x128xf32>
      tpu.vector_store %arg7[%c0_43, %c0_44], %113 {strides = array<i32>} : memref<8x128xf32, #tpu.memory_space<vmem>>, vector<8x128xf32>,
      %cst_45 = arith.constant 0.000000e+00 : f32
      %115 = vector.broadcast %cst_45 : f32 to vector<8x128xf32>
      %c0_46 = arith.constant 0 : index
      %c0_47 = arith.constant 0 : index
      %116 = vector.load %arg8[%c0_46, %c0_47] : memref<8x128xf32, #tpu.memory_space<vmem>>, vector<8x128xf32>
      tpu.vector_store %arg8[%c0_46, %c0_47], %115 {strides = array<i32>} : memref<8x128xf32, #tpu.memory_space<vmem>>, vector<8x128xf32>,
      %cst_48 = arith.constant 0.000000e+00 : f32
      %117 = vector.broadcast %cst_48 : f32 to vector<8x128xf32>
      %c0_49 = arith.constant 0 : index
      %c0_50 = arith.constant 0 : index
      %118 = vector.load %arg9[%c0_49, %c0_50] : memref<8x128xf32, #tpu.memory_space<vmem>>, vector<8x128xf32>
      tpu.vector_store %arg9[%c0_49, %c0_50], %117 {strides = array<i32>} : memref<8x128xf32, #tpu.memory_space<vmem>>, vector<8x128xf32>,
    } else {
    }
    %c0 = arith.constant 0 : index
    %c0_1 = arith.constant 0 : index
    %3 = vector.load %arg2[%c0, %c0_1] : memref<16x128xf32, #tpu.memory_space<vmem>>, vector<16x128xf32>
    %c0_2 = arith.constant 0 : index
    %c0_3 = arith.constant 0 : index
    %4 = vector.load %arg3[%c0_2, %c0_3] : memref<16x128xf32, #tpu.memory_space<vmem>>, vector<16x128xf32>
    %cst = arith.constant dense<0xFF800000> : vector<16xf32>
    %5 = vector.multi_reduction <maximumf>, %3, %cst [1] : vector<16x128xf32> to vector<16xf32>
    %6 = vector.shape_cast %5 : vector<16xf32> to vector<16x1xf32>
    %7 = vector.broadcast %6 : vector<16x1xf32> to vector<16x128xf32>
    %8 = arith.subf %3, %7 : vector<16x128xf32>
    %9 = math.exp %8 : vector<16x128xf32>
    %cst_4 = arith.constant dense<0.000000e+00> : vector<16xf32>
    %10 = vector.multi_reduction <add>, %9, %cst_4 [1] : vector<16x128xf32> to vector<16xf32>
    %11 = vector.shape_cast %10 : vector<16xf32> to vector<16x1xf32>
    %12 = tpu.reciprocal %11 {approx = true} : vector<16x1xf32> -> vector<16x1xf32>
    %13 = arith.mulf %11, %12 : vector<16x1xf32>
    %cst_5 = arith.constant 2.000000e+00 : f32
    %14 = vector.broadcast %cst_5 : f32 to vector<16x1xf32>
    %15 = arith.subf %14, %13 : vector<16x1xf32>
    %16 = arith.mulf %12, %15 : vector<16x1xf32>
    %17 = arith.mulf %9, %9 : vector<16x128xf32>
    %cst_6 = arith.constant dense<0.000000e+00> : vector<16xf32>
    %18 = vector.multi_reduction <add>, %17, %cst_6 [1] : vector<16x128xf32> to vector<16xf32>
    %19 = vector.shape_cast %18 : vector<16xf32> to vector<16x1xf32>
    %20 = tpu.reciprocal %19 {approx = true} : vector<16x1xf32> -> vector<16x1xf32>
    %21 = arith.mulf %19, %20 : vector<16x1xf32>
    %cst_7 = arith.constant 2.000000e+00 : f32
    %22 = vector.broadcast %cst_7 : f32 to vector<16x1xf32>
    %23 = arith.subf %22, %21 : vector<16x1xf32>
    %24 = arith.mulf %20, %23 : vector<16x1xf32>
    %25 = vector.broadcast %16 : vector<16x1xf32> to vector<16x128xf32>
    %26 = arith.mulf %9, %25 : vector<16x128xf32>
    %27 = vector.broadcast %24 : vector<16x1xf32> to vector<16x128xf32>
    %28 = arith.mulf %17, %27 : vector<16x128xf32>
    %c0_8 = arith.constant 0 : index
    %c0_9 = arith.constant 0 : index
    %29 = vector.load %arg8[%c0_8, %c0_9] : memref<8x128xf32, #tpu.memory_space<vmem>>, vector<8x128xf32>
    %30 = vector.shape_cast %28 : vector<16x128xf32> to vector<2x8x128xf32>
    %cst_10 = arith.constant dense<0.000000e+00> : vector<8x128xf32>
    %31 = vector.multi_reduction <add>, %30, %cst_10 [0] : vector<2x8x128xf32> to vector<8x128xf32>
    %32 = arith.addf %29, %31 : vector<8x128xf32>
    %c0_11 = arith.constant 0 : index
    %c0_12 = arith.constant 0 : index
    %33 = vector.load %arg8[%c0_11, %c0_12] : memref<8x128xf32, #tpu.memory_space<vmem>>, vector<8x128xf32>
    tpu.vector_store %arg8[%c0_11, %c0_12], %32 {strides = array<i32>} : memref<8x128xf32, #tpu.memory_space<vmem>>, vector<8x128xf32>,
    %cst_13 = arith.constant 9.99999974E-6 : f32
    %34 = vector.broadcast %cst_13 : f32 to vector<16x128xf32>
    %35 = arith.addf %26, %34 : vector<16x128xf32>
    %36 = math.log %35 : vector<16x128xf32>
    %cst_14 = arith.constant 9.99999974E-6 : f32
    %37 = vector.broadcast %cst_14 : f32 to vector<16x128xf32>
    %38 = arith.addf %28, %37 : vector<16x128xf32>
    %39 = math.log %38 : vector<16x128xf32>
    %40 = arith.mulf %28, %39 : vector<16x128xf32>
    %cst_15 = arith.constant dense<0xFF800000> : vector<16xf32>
    %41 = vector.multi_reduction <maximumf>, %4, %cst_15 [1] : vector<16x128xf32> to vector<16xf32>
    %42 = vector.shape_cast %41 : vector<16xf32> to vector<16x1xf32>
    %43 = vector.broadcast %42 : vector<16x1xf32> to vector<16x128xf32>
    %44 = arith.subf %4, %43 : vector<16x128xf32>
    %45 = math.exp %44 : vector<16x128xf32>
    %cst_16 = arith.constant dense<0.000000e+00> : vector<16xf32>
    %46 = vector.multi_reduction <add>, %45, %cst_16 [1] : vector<16x128xf32> to vector<16xf32>
    %47 = vector.shape_cast %46 : vector<16xf32> to vector<16x1xf32>
    %48 = tpu.reciprocal %47 {approx = true} : vector<16x1xf32> -> vector<16x1xf32>
    %49 = arith.mulf %47, %48 : vector<16x1xf32>
    %cst_17 = arith.constant 2.000000e+00 : f32
    %50 = vector.broadcast %cst_17 : f32 to vector<16x1xf32>
    %51 = arith.subf %50, %49 : vector<16x1xf32>
    %52 = arith.mulf %48, %51 : vector<16x1xf32>
    %53 = arith.mulf %45, %45 : vector<16x128xf32>
    %cst_18 = arith.constant dense<0.000000e+00> : vector<16xf32>
    %54 = vector.multi_reduction <add>, %53, %cst_18 [1] : vector<16x128xf32> to vector<16xf32>
    %55 = vector.shape_cast %54 : vector<16xf32> to vector<16x1xf32>
    %56 = tpu.reciprocal %55 {approx = true} : vector<16x1xf32> -> vector<16x1xf32>
    %57 = arith.mulf %55, %56 : vector<16x1xf32>
    %cst_19 = arith.constant 2.000000e+00 : f32
    %58 = vector.broadcast %cst_19 : f32 to vector<16x1xf32>
    %59 = arith.subf %58, %57 : vector<16x1xf32>
    %60 = arith.mulf %56, %59 : vector<16x1xf32>
    %61 = vector.broadcast %52 : vector<16x1xf32> to vector<16x128xf32>
    %62 = arith.mulf %45, %61 : vector<16x128xf32>
    %63 = vector.broadcast %60 : vector<16x1xf32> to vector<16x128xf32>
    %64 = arith.mulf %53, %63 : vector<16x128xf32>
    %c0_20 = arith.constant 0 : index
    %c0_21 = arith.constant 0 : index
    %65 = vector.load %arg9[%c0_20, %c0_21] : memref<8x128xf32, #tpu.memory_space<vmem>>, vector<8x128xf32>
    %66 = vector.shape_cast %64 : vector<16x128xf32> to vector<2x8x128xf32>
    %cst_22 = arith.constant dense<0.000000e+00> : vector<8x128xf32>
    %67 = vector.multi_reduction <add>, %66, %cst_22 [0] : vector<2x8x128xf32> to vector<8x128xf32>
    %68 = arith.addf %65, %67 : vector<8x128xf32>
    %c0_23 = arith.constant 0 : index
    %c0_24 = arith.constant 0 : index
    %69 = vector.load %arg9[%c0_23, %c0_24] : memref<8x128xf32, #tpu.memory_space<vmem>>, vector<8x128xf32>
    tpu.vector_store %arg9[%c0_23, %c0_24], %68 {strides = array<i32>} : memref<8x128xf32, #tpu.memory_space<vmem>>, vector<8x128xf32>,
    %cst_25 = arith.constant 9.99999974E-6 : f32
    %70 = vector.broadcast %cst_25 : f32 to vector<16x128xf32>
    %71 = arith.addf %62, %70 : vector<16x128xf32>
    %72 = math.log %71 : vector<16x128xf32>
    %cst_26 = arith.constant 9.99999974E-6 : f32
    %73 = vector.broadcast %cst_26 : f32 to vector<16x128xf32>
    %74 = arith.addf %64, %73 : vector<16x128xf32>
    %75 = math.log %74 : vector<16x128xf32>
    %76 = arith.mulf %64, %75 : vector<16x128xf32>
    %77 = arith.subf %26, %62 : vector<16x128xf32>
    %78 = arith.subf %36, %72 : vector<16x128xf32>
    %79 = arith.mulf %77, %78 : vector<16x128xf32>
    %cst_27 = arith.constant dense<0.000000e+00> : vector<16xf32>
    %80 = vector.multi_reduction <add>, %79, %cst_27 [1] : vector<16x128xf32> to vector<16xf32>
    %81 = vector.shape_cast %80 : vector<16xf32> to vector<16x1xf32>
    %cst_28 = arith.constant 5.000000e-01 : f32
    %82 = vector.broadcast %cst_28 : f32 to vector<16x1xf32>
    %83 = arith.mulf %82, %81 : vector<16x1xf32>
    %84 = arith.addf %40, %76 : vector<16x128xf32>
    %cst_29 = arith.constant dense<0.000000e+00> : vector<16xf32>
    %85 = vector.multi_reduction <add>, %84, %cst_29 [1] : vector<16x128xf32> to vector<16xf32>
    %86 = vector.shape_cast %85 : vector<16xf32> to vector<16x1xf32>
    %cst_30 = arith.constant -5.000000e-01 : f32
    %87 = vector.broadcast %cst_30 : f32 to vector<16x1xf32>
    %88 = arith.mulf %87, %86 : vector<16x1xf32>
    %89 = vector.shape_cast %83 : vector<16x1xf32> to vector<2x8x1xf32>
    %cst_31 = arith.constant dense<0.000000e+00> : vector<8x1xf32>
    %90 = vector.multi_reduction <add>, %89, %cst_31 [0] : vector<2x8x1xf32> to vector<8x1xf32>
    %91 = vector.shape_cast %88 : vector<16x1xf32> to vector<2x8x1xf32>
    %cst_32 = arith.constant dense<0.000000e+00> : vector<8x1xf32>
    %92 = vector.multi_reduction <add>, %91, %cst_32 [0] : vector<2x8x1xf32> to vector<8x1xf32>
    %93 = tpu.iota {dimensions = array<i32: 1>} : vector<8x128xi32>
    %c0_33 = arith.constant 0 : index
    %c0_34 = arith.constant 0 : index
    %94 = vector.load %arg7[%c0_33, %c0_34] : memref<8x128xf32, #tpu.memory_space<vmem>>, vector<8x128xf32>
    %c0_i32_35 = arith.constant 0 : i32
    %95 = vector.broadcast %c0_i32_35 : i32 to vector<8x128xi32>
    %96 = arith.cmpi eq, %93, %95 : vector<8x128xi32>
    %cst_36 = arith.constant 0.000000e+00 : f32
    %97 = vector.shape_cast %90 : vector<8x1xf32> to vector<8x1xf32>
    %98 = vector.broadcast %97 : vector<8x1xf32> to vector<8x128xf32>
    %99 = vector.broadcast %cst_36 : f32 to vector<8x128xf32>
    %100 = arith.select %96, %98, %99 : vector<8x128xi1>, vector<8x128xf32>
    %c1_i32 = arith.constant 1 : i32
    %101 = vector.broadcast %c1_i32 : i32 to vector<8x128xi32>
    %102 = arith.cmpi eq, %93, %101 : vector<8x128xi32>
    %cst_37 = arith.constant 0.000000e+00 : f32
    %103 = vector.shape_cast %92 : vector<8x1xf32> to vector<8x1xf32>
    %104 = vector.broadcast %103 : vector<8x1xf32> to vector<8x128xf32>
    %105 = vector.broadcast %cst_37 : f32 to vector<8x128xf32>
    %106 = arith.select %102, %104, %105 : vector<8x128xi1>, vector<8x128xf32>
    %107 = arith.addf %100, %106 : vector<8x128xf32>
    %108 = arith.addf %94, %107 : vector<8x128xf32>
    %c0_38 = arith.constant 0 : index
    %c0_39 = arith.constant 0 : index
    %109 = vector.load %arg7[%c0_38, %c0_39] : memref<8x128xf32, #tpu.memory_space<vmem>>, vector<8x128xf32>
    tpu.vector_store %arg7[%c0_38, %c0_39], %108 {strides = array<i32>} : memref<8x128xf32, #tpu.memory_space<vmem>>, vector<8x128xf32>,
    %c0_i32_40 = arith.constant 0 : i32
    %110 = arith.cmpi eq, %arg1, %c0_i32_40 : i32
    %111 = arith.extui %110 : i1 to i32
    %c0_i32_41 = arith.constant 0 : i32
    %112 = arith.cmpi ne, %111, %c0_i32_41 : i32
    scf.if %112 {
      %c0_42 = arith.constant 0 : index
      %c0_43 = arith.constant 0 : index
      %113 = vector.load %arg7[%c0_42, %c0_43] : memref<8x128xf32, #tpu.memory_space<vmem>>, vector<8x128xf32>
      %cst_44 = arith.constant dense<0.000000e+00> : vector<128xf32>
      %114 = vector.multi_reduction <add>, %113, %cst_44 [0] : vector<8x128xf32> to vector<128xf32>
      %115 = vector.shape_cast %114 : vector<128xf32> to vector<1x128xf32>
      %c0_45 = arith.constant 0 : index
      %c0_46 = arith.constant 0 : index
      %116 = vector.load %arg4[%c0_45, %c0_46] : memref<1x128xf32, #tpu.memory_space<vmem>>, vector<1x128xf32>
      tpu.vector_store %arg4[%c0_45, %c0_46], %115 {strides = array<i32>} : memref<1x128xf32, #tpu.memory_space<vmem>>, vector<1x128xf32>,
      %c0_47 = arith.constant 0 : index
      %c0_48 = arith.constant 0 : index
      %117 = vector.load %arg8[%c0_47, %c0_48] : memref<8x128xf32, #tpu.memory_space<vmem>>, vector<8x128xf32>
      %cst_49 = arith.constant dense<0.000000e+00> : vector<128xf32>
      %118 = vector.multi_reduction <add>, %117, %cst_49 [0] : vector<8x128xf32> to vector<128xf32>
      %119 = vector.shape_cast %118 : vector<128xf32> to vector<1x128xf32>
      %c0_50 = arith.constant 0 : index
      %c0_51 = arith.constant 0 : index
      %120 = vector.load %arg5[%c0_50, %c0_51] : memref<1x128xf32, #tpu.memory_space<vmem>>, vector<1x128xf32>
      tpu.vector_store %arg5[%c0_50, %c0_51], %119 {strides = array<i32>} : memref<1x128xf32, #tpu.memory_space<vmem>>, vector<1x128xf32>,
      %c0_52 = arith.constant 0 : index
      %c0_53 = arith.constant 0 : index
      %121 = vector.load %arg9[%c0_52, %c0_53] : memref<8x128xf32, #tpu.memory_space<vmem>>, vector<8x128xf32>
      %cst_54 = arith.constant dense<0.000000e+00> : vector<128xf32>
      %122 = vector.multi_reduction <add>, %121, %cst_54 [0] : vector<8x128xf32> to vector<128xf32>
      %123 = vector.shape_cast %122 : vector<128xf32> to vector<1x128xf32>
      %c0_55 = arith.constant 0 : index
      %c0_56 = arith.constant 0 : index
      %124 = vector.load %arg6[%c0_55, %c0_56] : memref<1x128xf32, #tpu.memory_space<vmem>>, vector<1x128xf32>
      tpu.vector_store %arg6[%c0_55, %c0_56], %123 {strides = array<i32>} : memref<1x128xf32, #tpu.memory_space<vmem>>, vector<1x128xf32>,
    } else {
    }
    return
  }
  func.func @transform_0(%arg0: i32, %arg1: i32) -> (i32, i32) {
    %c1_i32 = arith.constant 1 : i32
    %0 = arith.muli %arg0, %c1_i32 : i32
    %1 = arith.addi %0, %arg1 : i32
    %c0_i32 = arith.constant 0 : i32
    %c0_i32_0 = arith.constant 0 : i32
    return %1, %c0_i32 : i32, i32
  }
  func.func @transform_1(%arg0: i32, %arg1: i32) -> (i32, i32) {
    %c1_i32 = arith.constant 1 : i32
    %0 = arith.muli %arg0, %c1_i32 : i32
    %1 = arith.addi %0, %arg1 : i32
    %c0_i32 = arith.constant 0 : i32
    %c0_i32_0 = arith.constant 0 : i32
    return %1, %c0_i32 : i32, i32
  }
  func.func @transform_2(%arg0: i32, %arg1: i32) -> (i32, i32) {
    %c0_i32 = arith.constant 0 : i32
    %c0_i32_0 = arith.constant 0 : i32
    return %arg0, %c0_i32 : i32, i32
  }
  func.func @transform_3(%arg0: i32, %arg1: i32) -> (i32, i32) {
    %c0_i32 = arith.constant 0 : i32
    %c0_i32_0 = arith.constant 0 : i32
    return %arg0, %c0_i32 : i32, i32
  }
  func.func @transform_4(%arg0: i32, %arg1: i32) -> (i32, i32) {
    %c0_i32 = arith.constant 0 : i32
    %c0_i32_0 = arith.constant 0 : i32
    return %arg0, %c0_i32 : i32, i32
  }
}

</mosaic_0001>

<bundles_post_ra>
// kernel: tpu_custom_call.1
= control target key start
LH: loop header
LB: loop body
LE: loop exit
PB: predicated region body
PF: predicated region fallthrough
CT: control target
= control target key end

     0   :  { %10 = vsyncpa [#allocation6], 0  ;;  %s545_s0 = inlined_call_operand.hbm [shape: f32[16,128], index: 0, kind: input, shape index: {}]   ;;  %s546_s1 = inlined_call_operand.hbm [shape: f32[16,128], index: 1, kind: input, shape index: {}]   ;;  %s547_s2 = inlined_call_operand.hbm [shape: f32[1,128], index: 2, kind: output, shape index: {0}]   ;;  %s548_s3 = inlined_call_operand.hbm [shape: f32[1,128], index: 3, kind: output, shape index: {1}]   ;;  %s549_s4 = inlined_call_operand.hbm [shape: f32[1,128], index: 4, kind: output, shape index: {2}]  }
   0x1   :  { %11 = vsyncpa [#allocation9], 0 }
   0x2   :  { %12 = vsyncpa [#allocation7], 0 }
   0x3   :  { %13 = vsyncpa [#allocation12], 0  ;;  %s22_s17 = sshll.u32 %s545_s0, 4  ;;  %s470_s18 = smov [#allocation5]   ;;  %s23_s17 = int_to_ptr.hbm [resolvable:$true] %s22_s17 }
   0x4   :  { %s24_s19 = sshll.u32 %s470_s18, 4  ;;  %s39_s22 = sshll.u32 %s546_s1, 4  ;;  %s25_s19 = int_to_ptr.vmem [resolvable:$true] %s24_s19  ;;  %s40_s22 = int_to_ptr.hbm [resolvable:$true] %s39_s22 }
   0x5   :  { %s471_s23 = smov 128   ;;  %s472_s24 = smov 8  }
   0x6   :  { %30 = dma.hbm_to_vmem [thread:$0]  %s23_s17, 256, %s25_s19, [#allocation6], %s471_s23, %s471_s23, %s472_s24  }
   0x7   :  { %s473_s25 = smov [#allocation8]  }
   0x8   :  { %s41_s26 = sshll.u32 %s473_s25, 4  ;;  %s42_s26 = int_to_ptr.vmem [resolvable:$true] %s41_s26 }
   0x9   :  { %47 = dma.hbm_to_vmem [thread:$0]  %s40_s22, 256, %s42_s26, [#allocation9], %s471_s23, %s471_s23, %s472_s24  }
   0xa   :  { %462 = dma.done.wait [#allocation6], 256  }
   0xb   :  { %463 = vsyncadd [#allocation6], 4294967040 }
   0xc   :  { %464 = dma.done.wait [#allocation9], 256  }
   0xd   :  { %465 = vsyncadd [#allocation9], 4294967040  ;;  %v67_v0 = vld [vmem:[#allocation5] sm:$0xff]  ;;  %v69_v1 = vld [vmem:[#allocation8] sm:$0xff]  ;;  %s264_s27 = sshll.u32 %s548_s3, 4  ;;  %s474_s28 = smov [#allocation11]   ;;  %s265_s27 = int_to_ptr.hbm [resolvable:$true] %s264_s27 }
   0xe   :  { %71 = vmax.xlane.f32.xlu0 %v67_v0  ;;  %129 = vmax.xlane.f32.xlu1 %v69_v1  ;;  %v68_v2 = vld [vmem:[#allocation5 + $0x8] sm:$0xff]  ;;  %v70_v3 = vld [vmem:[#allocation8 + $0x8] sm:$0xff]  ;;  %s262_s29 = sshll.u32 %s474_s28, 4  ;;  %s475_s30 = smov [#allocation13]   ;;  %s263_s29 = int_to_ptr.vmem [resolvable:$true] %s262_s29 }
   0xf   :  { %s273_s5 = sshll.u32 %s475_s30, 4  ;;  %s275_s8 = sshll.u32 %s549_s4, 4  ;;  %s274_s5 = int_to_ptr.vmem [resolvable:$true] %s273_s5  ;;  %s276_s8 = int_to_ptr.hbm [resolvable:$true] %s275_s8 }
  0x10   :  { %s476_s3 = smov [#allocation10]   ;;  %s253_s11 = sshll.u32 %s547_s2, 4  ;;  %s254_s11 = int_to_ptr.hbm [resolvable:$true] %s253_s11 }
  0x11   :  { %s251_s4 = sshll.u32 %s476_s3, 4  ;;  %s252_s4 = int_to_ptr.vmem [resolvable:$true] %s251_s4 }
  0x16   :  { %73 = vmax.xlane.f32.xlu0 %v68_v2  ;;  %131 = vmax.xlane.f32.xlu1 %v70_v3 }
  0x81   :  { %v72_v4 = vpop.xlane.xlu0 %71  ;;  %v130_v5 = vpop.xlane.xlu1 %129 }
  0x82   :  { %v75_v6 = vsub.f32 %v67_v0, %v72_v4  ;;  %v133_v13 = vsub.f32 %v69_v1, %v130_v5 }
  0x84   :  { %v77_v7 = vmul.f32 1.442695, %v75_v6  ;;  %v135_v17 = vmul.f32 1.442695, %v133_v13 }
  0x86   :  { %302 = vpow2.f32 %v77_v7 }
  0x89   :  { %v74_v8 = vpop.xlane.xlu0 %73  ;;  %v132_v9 = vpop.xlane.xlu1 %131 }
  0x8a   :  { %v76_v10 = vsub.f32 %v68_v2, %v74_v8  ;;  %v134_v11 = vsub.f32 %v70_v3, %v132_v9 }
  0x8c   :  { %v303_v12 = vpop.eup %302  ;;  %v79_v14 = vmul.f32 1.442695, %v76_v10  ;;  %v137_v15 = vmul.f32 1.442695, %v134_v11 }
  0x8d   :  { %81 = vadd.xlane.f32.xlu2 %v303_v12  ;;  %v93_v16 = vmul.f32 %v303_v12, %v303_v12 }
  0x8e   :  { %304 = vpow2.f32 %v79_v14 }
  0x8f   :  { %306 = vpow2.f32 %v137_v15  ;;  %95 = vadd.xlane.f32.xlu0 %v93_v16 }
  0x90   :  { %308 = vpow2.f32 %v135_v17 }
  0x94   :  { %v305_v18 = vpop.eup %304 }
  0x95   :  { %v307_v19 = vpop.eup %306  ;;  %83 = vadd.xlane.f32.xlu2 %v305_v18  ;;  %v94_v20 = vmul.f32 %v305_v18, %v305_v18 }
  0x96   :  { %v508_v21 = vpop.eup %308  ;;  %v516_v23 = vmul.f32 %v307_v19, %v307_v19 }
  0x97   :  { %141 = vadd.xlane.f32.xlu0 %v307_v19  ;;  %97 = vadd.xlane.f32.xlu1 %v94_v20  ;;  %v513_v22 = vmul.f32 %v508_v21, %v508_v21 }
  0x9d   :  { %139 = vadd.xlane.f32.xlu2 %v508_v21 }
  0x9f   :  { %153 = vadd.xlane.f32.xlu1 %v513_v22 }
  0xa5   :  { %155 = vadd.xlane.f32.xlu2 %v516_v23 }
 0x100   :  { %v82_v24 = vpop.xlane.xlu2 %81 }
 0x101   :  { %310 = vrcp.f32 %v82_v24 }
 0x102   :  { %v96_v25 = vpop.xlane.xlu0 %95 }
 0x103   :  { %312 = vrcp.f32 %v96_v25 }
 0x107   :  { %v311_v26 = vpop.eup %310 }
 0x108   :  { %v84_v27 = vpop.xlane.xlu2 %83  ;;  %v87_v31 = vmul.f32 %v311_v26, %v82_v24 }
 0x109   :  { %v313_v28 = vpop.eup %312  ;;  %314 = vrcp.f32 %v84_v27 }
 0x10a   :  { %v98_v29 = vpop.xlane.xlu1 %97  ;;  %v142_v30 = vpop.xlane.xlu0 %141  ;;  %v101_v32 = vmul.f32 %v313_v28, %v96_v25  ;;  %v89_v34 = vsub.f32 2.0, %v87_v31 }
 0x10b   :  { %316 = vrcp.f32 %v98_v29 }
 0x10c   :  { %318 = vrcp.f32 %v142_v30  ;;  %v103_v35 = vsub.f32 2.0, %v101_v32  ;;  %v91_v43 = vmul.f32 %v311_v26, %v89_v34 }
 0x10e   :  { %v105_v45 = vmul.f32 %v313_v28, %v103_v35  ;;  %v519_v53 = vmul.f32 %v303_v12, %v91_v43 }
 0x10f   :  { %v315_v33 = vpop.eup %314 }
 0x110   :  { %v88_v36 = vmul.f32 %v315_v33, %v84_v27  ;;  %v140_v37 = vpop.xlane.xlu2 %139  ;;  %v521_v54 = vmul.f32 %v105_v45, %v93_v16  ;;  %v115_v1 = vadd.f32 1e-05, %v519_v53 }
 0x111   :  { %v317_v38 = vpop.eup %316  ;;  %320 = vrcp.f32 %v140_v37 }
 0x112   :  { %v319_v39 = vpop.eup %318  ;;  %v90_v40 = vsub.f32 2.0, %v88_v36  ;;  %v102_v41 = vmul.f32 %v317_v38, %v98_v29  ;;  %v154_v42 = vpop.xlane.xlu1 %153  ;;  %v121_v4 = vadd.f32 1e-05, %v521_v54 }
 0x113   :  { %v146_v44 = vmul.f32 %v319_v39, %v142_v30  ;;  %322 = vrcp.f32 %v154_v42 }
 0x114   :  { %v92_v46 = vmul.f32 %v315_v33, %v90_v40  ;;  %v104_v47 = vsub.f32 2.0, %v102_v41 }
 0x115   :  { %v148_v48 = vsub.f32 2.0, %v146_v44 }
 0x116   :  { %v106_v49 = vmul.f32 %v317_v38, %v104_v47  ;;  %v108_v50 = vmul.f32 %v305_v18, %v92_v46 }
 0x117   :  { %v321_v51 = vpop.eup %320  ;;  %v150_v52 = vmul.f32 %v319_v39, %v148_v48 }
 0x118   :  { %v523_v55 = vmul.f32 %v106_v49, %v94_v20  ;;  %v145_v56 = vmul.f32 %v321_v51, %v140_v37  ;;  %v156_v57 = vpop.xlane.xlu2 %155  ;;  %v116_v58 = vadd.f32 1e-05, %v108_v50 }
 0x119   :  { %v323_v59 = vpop.eup %322  ;;  %324 = vrcp.f32 %v156_v57  ;;  %v166_v60 = vmul.f32 %v307_v19, %v150_v52 }
 0x11a   :  { %v112_v61 = vadd.f32 %v523_v55, %v521_v54  ;;  %v147_v62 = vsub.f32 2.0, %v145_v56  ;;  %v159_v63 = vmul.f32 %v323_v59, %v154_v42  ;;  %326 = vlog2.f32 %v116_v58 }
 0x11b   :  { %v174_v0 = vadd.f32 1e-05, %v166_v60  ;;  %v122_v17 = vadd.f32 1e-05, %v523_v55  ;;  %v188_v28 = vsub.f32 %v108_v50, %v166_v60 }
 0x11c   :  { %v149_v2 = vmul.f32 %v321_v51, %v147_v62  ;;  %v161_v3 = vsub.f32 2.0, %v159_v63  ;;  %v231_v5 = vrot.slane %v112_v61, 4 }
 0x11d   :  { %328 = vlog2.f32 %v174_v0 }
 0x11e   :  { %v163_v6 = vmul.f32 %v323_v59, %v161_v3  ;;  %v165_v7 = vmul.f32 %v508_v21, %v149_v2  ;;  %v232_v8 = vadd.f32 %v231_v5, %v112_v61  ;;  %330 = vlog2.f32 %v115_v1 }
 0x11f   :  { %v325_v9 = vpop.eup %324  ;;  %332 = vlog2.f32 %v121_v4 }
 0x120   :  { %v167_v10 = vmul.f32 %v163_v6, %v513_v22  ;;  %v160_v11 = vmul.f32 %v325_v9, %v156_v57  ;;  %v173_v12 = vadd.f32 1e-05, %v165_v7  ;;  %v327_v13 = vpop.eup %326  ;;  %v233_v14 = vrot.slane %v232_v8, 2 }
 0x121   :  { %v120_v24 = vmul.f32 0.6931472, %v327_v13  ;;  %v187_v40 = vsub.f32 %v519_v53, %v165_v7 }
 0x122   :  { %v162_v15 = vsub.f32 2.0, %v160_v11  ;;  %334 = vlog2.f32 %v173_v12  ;;  %v179_v16 = vadd.f32 1e-05, %v167_v10  ;;  %v234_v19 = vadd.f32 %v233_v14, %v232_v8 }
 0x123   :  { %v329_v18 = vpop.eup %328 }
 0x124   :  { %v164_v20 = vmul.f32 %v325_v9, %v162_v15  ;;  %v178_v21 = vmul.f32 0.6931472, %v329_v18  ;;  %336 = vlog2.f32 %v179_v16  ;;  %v331_v25 = vpop.eup %330  ;;  %v235_v26 = vrot.slane %v234_v19, 1 }
 0x125   :  { %v333_v27 = vpop.eup %332  ;;  %338 = vlog2.f32 %v122_v17  ;;  %v118_v34 = vmul.f32 0.6931472, %v331_v25 }
 0x126   :  { %v168_v22 = vmul.f32 %v164_v20, %v516_v23  ;;  %v190_v29 = vsub.f32 %v120_v24, %v178_v21  ;;  %v236_v30 = vadd.f32 %v235_v26, %v234_v19  ;;  %v124_v37 = vmul.f32 0.6931472, %v333_v27 }
 0x128   :  { %v335_v31 = vpop.eup %334  ;;  %v170_v32 = vadd.f32 %v168_v22, %v167_v10  ;;  %v192_v33 = vmul.f32 %v190_v29, %v188_v28  ;;  %v180_v35 = vadd.f32 1e-05, %v168_v22  ;;  %237 = vst [vmem:[#allocation11] sm:$0x1] %v236_v30  ;;  %v127_v45 = vmul.f32 %v124_v37, %v521_v54 }
 0x129   :  { %v176_v36 = vmul.f32 0.6931472, %v335_v31  ;;  %267 = dma.vmem_to_hbm [thread:$0]  %s263_s29, 16, %s265_s27, [#allocation12]  }
 0x12a   :  { %v337_v38 = vpop.eup %336  ;;  %v239_v39 = vrot.slane %v170_v32, 4  ;;  %195 = vadd.xlane.f32.xlu1 %v192_v33  ;;  %340 = vlog2.f32 %v180_v35 }
 0x12b   :  { %v189_v41 = vsub.f32 %v118_v34, %v176_v36  ;;  %v182_v23 = vmul.f32 0.6931472, %v337_v38  ;;  %v339_v42 = vpop.eup %338 }
 0x12c   :  { %v240_v43 = vadd.f32 %v239_v39, %v170_v32  ;;  %v126_v49 = vmul.f32 0.6931472, %v339_v42 }
 0x12d   :  { %v191_v44 = vmul.f32 %v189_v41, %v187_v40  ;;  %v185_v46 = vmul.f32 %v182_v23, %v167_v10 }
 0x12e   :  { %v241_v47 = vrot.slane %v240_v43, 2  ;;  %v128_v57 = vmul.f32 %v126_v49, %v523_v55  ;;  %v209_v55 = vlaneseq }
 0x12f   :  { %193 = vadd.xlane.f32.xlu0 %v191_v44  ;;  %v199_v48 = vadd.f32 %v185_v46, %v127_v45 }
 0x130   :  { %v341_v50 = vpop.eup %340  ;;  %v242_v51 = vadd.f32 %v241_v47, %v240_v43  ;;  %v210_v62 = vand.u32 127, %v209_v55 }
 0x131   :  { %201 = vadd.xlane.f32.xlu2 %v199_v48  ;;  %v184_v52 = vmul.f32 0.6931472, %v341_v50 }
 0x132   :  { %v243_v56 = vrot.slane %v242_v51, 1  ;;  %vm212_vm0 = vcmp.eq.s32.totalorder %v210_v62, 0  ;;  %vm214_vm1 = vcmp.eq.s32.totalorder %v210_v62, 1 }
 0x133   :  { %v186_v53 = vmul.f32 %v184_v52, %v168_v22 }
 0x134   :  { %v244_v58 = vadd.f32 %v243_v56, %v242_v51 }
 0x135   :  { %v200_v59 = vadd.f32 %v186_v53, %v128_v57 }
 0x136   :  { %245 = vst [vmem:[#allocation13] sm:$0x1] %v244_v58 }
 0x137   :  { %203 = vadd.xlane.f32.xlu0 %v200_v59  ;;  %278 = dma.vmem_to_hbm [thread:$0]  %s274_s5, 16, %s276_s8, [#allocation12]  }
 0x19d   :  { %v196_v60 = vpop.xlane.xlu1 %195 }
 0x19e   :  { %v198_v0 = vmul.f32 0.5, %v196_v60 }
 0x1a2   :  { %v194_v54 = vpop.xlane.xlu0 %193 }
 0x1a3   :  { %v197_v61 = vmul.f32 0.5, %v194_v54 }
 0x1a4   :  { %v202_v63 = vpop.xlane.xlu2 %201 }
 0x1a5   :  { %v207_v2 = vadd.f32 %v198_v0, %v197_v61  ;;  %v205_v3 = vmul.f32 -0.5, %v202_v63 }
 0x1a7   :  { %v213_v6 = vsel %vm212_vm0, %v207_v2, 0.0 }
 0x1aa   :  { %v204_v1 = vpop.xlane.xlu0 %203 }
 0x1ab   :  { %v206_v4 = vmul.f32 -0.5, %v204_v1 }
 0x1ad   :  { %v208_v5 = vadd.f32 %v206_v4, %v205_v3 }
 0x1af   :  { %v215_v7 = vsel %vm214_vm1, %v208_v5, 0.0 }
 0x1b0   :  { %v216_v8 = vadd.f32 %v215_v7, %v213_v6 }
 0x1b2   :  { %v223_v9 = vrot.slane %v216_v8, 4 }
 0x1b4   :  { %v224_v10 = vadd.f32 %v223_v9, %v216_v8 }
 0x1b6   :  { %v225_v11 = vrot.slane %v224_v10, 2 }
 0x1b8   :  { %v226_v12 = vadd.f32 %v225_v11, %v224_v10 }
 0x1ba   :  { %v227_v13 = vrot.slane %v226_v12, 1 }
 0x1bc   :  { %v228_v14 = vadd.f32 %v227_v13, %v226_v12 }
 0x1be   :  { %229 = vst [vmem:[#allocation10] sm:$0x1] %v228_v14 }
 0x1bf   :  { %256 = dma.vmem_to_hbm [thread:$0]  %s252_s4, 16, %s254_s11, [#allocation7]  }
 0x1c0   :  { %466 = dma.done.wait [#allocation7], 16  }
 0x1c1   :  { %467 = vsyncadd [#allocation7], 4294967280 }
 0x1c2   :  { %468 = dma.done.wait [#allocation12], 32  }
 0x1c3   :  { %469 = vsyncadd [#allocation12], 4294967264 }
 0x1c4   :  { %291 = vsyncpa [#allocation6], 1 }
 0x1c5   :  { %292 = vsyncpa [#allocation9], 1 }
 0x1c6   :  { %293 = vsyncpa [#allocation7], 1 }
 0x1c7   :  { %294 = vsyncpa [#allocation12], 1 }

</bundles_post_ra>
